<compile_context>
chip_gen: v5e
topology: v5e:2x2
jax: 0.10.0
libtpu: 0.0.40
codegen_flags: <defaults>
</compile_context>

<pallas_src>
import math
from functools import partial

import jax
import jax.numpy as jnp
from jax import lax
from jax.experimental import pallas as pl
from jax.experimental.pallas import tpu as pltpu


# ----------------------------------------------------------------------------
# Kernel: one (batch, row-tile) per grid step.  Internal layout:
#   rows (sublanes) = channels, lanes = flattened spatial positions (TH*W).
# ----------------------------------------------------------------------------
def _gdfn_kernel(x_ref, halo_ref, w_in_ref, w_dw_ref, w_out_ref, o_ref,
                 *, W, hid, use_mxu, approx_gelu):
    C = x_ref.shape[1]
    r = x_ref.shape[2]          # TH * W flattened spatial positions of this tile
    C2 = 2 * hid
    r_ext = r + 2 * W           # plus one halo image-row above and below

    x = x_ref[0]                # (C, r)
    halo = halo_ref[0, 0]       # (C, 2W): [:, :W] = row above, [:, W:] = row below
                                # (already zeroed at the image border by the wrapper)

    # Halo-extended input along lanes.  The concat happens on the small C-wide
    # array; the C2-wide projected halo comes out of the matmul for free.
    x_ext = jnp.concatenate([halo[:, :W], x, halo[:, W:]], axis=1)   # (C, r_ext)

    # ---- project_in: 1x1 conv == matmul over channels (MXU) ----
    if use_mxu:
        y = jnp.dot(w_in_ref[...], x_ext.astype(w_in_ref.dtype),
                    preferred_element_type=jnp.float32)              # (C2, r_ext) f32
    else:
        # tiny channel counts: a handful of VPU broadcast-FMAs beats the MXU
        w_in = w_in_ref[...].astype(jnp.float32)                     # (C2, C)
        y = w_in[:, 0:1] * x_ext[0:1, :]
        for c in range(1, C):
            y = y + w_in[:, c:c + 1] * x_ext[c:c + 1, :]

    # ---- depthwise 3x3 conv, padding=1 (f32, VPU + XLU) ----
    # Row taps: lane index l of y holds spatial position l - W, so
    #   value at (row-1, col) = y[:, p], (row, col) = y[:, p+W], (row+1, col) = y[:, p+2W].
    # pltpu.roll follows jnp.roll semantics (out[i] = in[i - shift]) and only
    # accepts non-negative shifts, hence the size-k rotations below.
    U_m = y[:, :r]                                                   # (row-1, col)
    U_0 = pltpu.roll(y, shift=r_ext - W, axis=1)[:, :r]              # (row,   col)
    U_p = pltpu.roll(y, shift=r_ext - 2 * W, axis=1)[:, :r]          # (row+1, col)

    w_dw = w_dw_ref[...].astype(jnp.float32)                         # (C2, 9), tap = 3*dy + dx
    # Combine the three row taps for each column offset dx (no zero-init accumulator).
    V0 = w_dw[:, 0:1] * U_m + w_dw[:, 3:4] * U_0 + w_dw[:, 6:7] * U_p   # dx = 0 (col-1)
    V1 = w_dw[:, 1:2] * U_m + w_dw[:, 4:5] * U_0 + w_dw[:, 7:8] * U_p   # dx = 1 (col)
    V2 = w_dw[:, 2:3] * U_m + w_dw[:, 5:6] * U_0 + w_dw[:, 8:9] * U_p   # dx = 2 (col+1)

    # Column taps: +-1 lane rolls with masks at the image-row edges (w==0 / w==W-1).
    col = lax.broadcasted_iota(jnp.int32, (1, r), 1)
    if (W & (W - 1)) == 0:
        j = col & (W - 1)                      # cheap for power-of-two widths
    else:
        j = lax.rem(col, W)                    # slow path; typical widths are pow2
    mask_l = (j != 0).astype(jnp.float32)
    mask_r = (j != W - 1).astype(jnp.float32)

    acc = (V1
           + pltpu.roll(V0, shift=1, axis=1) * mask_l
           + pltpu.roll(V2, shift=r - 1, axis=1) * mask_r)           # (C2, r) f32

    # ---- chunk(2) + GELU gate (f32) ----
    x1 = acc[:hid, :]
    x2 = acc[hid:, :]
    if approx_gelu:
        # tanh-based GELU runs on the EUP slot (off the VALU); small numeric
        # deviation from PyTorch's exact-erf GELU — opt-in only.
        g = jax.nn.gelu(x1, approximate=True) * x2
    else:
        g = 0.5 * x1 * (1.0 + lax.erf(x1 * (1.0 / math.sqrt(2.0)))) * x2

    # ---- project_out: 1x1 conv == matmul over channels (MXU) ----
    if use_mxu:
        out = jnp.dot(w_out_ref[...], g.astype(w_out_ref.dtype),
                      preferred_element_type=jnp.float32)            # (C, r)
    else:
        w_out = w_out_ref[...].astype(jnp.float32)                   # (C, hid)
        out = w_out[:, 0:1] * g[0:1, :]
        for k in range(1, hid):
            out = out + w_out[:, k:k + 1] * g[k:k + 1, :]

    o_ref[0] = out.astype(o_ref.dtype)


# ----------------------------------------------------------------------------
# Generation-aware tile-size selection / VMEM budgeting.
# ----------------------------------------------------------------------------
def _vmem_capacity_bytes():
    try:
        info = pltpu.get_tpu_info()
        cap = getattr(info, "vmem_capacity_bytes", None)
        if cap:
            return int(cap)
    except Exception:
        pass
    return 128 * 2**20      # v5e/v6e default if the query is unavailable


def _vmem_bytes_estimate(TH, W, C, C2, hid):
    r = TH * W
    r_ext = r + 2 * W
    f32 = 4
    io = 2 * f32 * (2 * C * r + 2 * C * W)                 # double-buffered x / out / halo blocks
    vals = f32 * (C * r_ext + C2 * r_ext + 7 * C2 * r      # x_ext, y, U*/V*/acc
                  + 2 * hid * r + 2 * C * r)               # gate + output
    wts = 2 * f32 * (C2 * C + 9 * C2 + C * hid)
    return io + vals + wts


def _choose_tile_h(B, H, W, C, C2, hid, *, capacity=None):
    if capacity is None:
        capacity = _vmem_capacity_bytes()
    budget = capacity // 5          # ~25 MiB on 128 MiB parts, ~12 MiB on v7x
    divisors = sorted((d for d in range(1, H + 1) if H % d == 0), reverse=True)
    fitting = [d for d in divisors if _vmem_bytes_estimate(d, W, C, C2, hid) <= budget]
    if not fitting:
        raise ValueError(
            "GDFN Pallas kernel: even a single image row exceeds the per-step "
            f"VMEM budget ({budget} bytes); reduce the image width or channel count.")
    # Prefer lane-dense tiles (TH*W a multiple of 128) for unmasked stores.
    aligned = [d for d in fitting if (d * W) % 128 == 0 or d == H]
    cands = aligned if aligned else fitting
    best = cands[0]
    # v7x megacore: prefer an even, >=2 total parallel grid so both TCs get
    # equal work, as long as it does not shrink the tile by more than 2x.
    for d in cands:
        total = B * (H // d)
        if total >= 2 and total % 2 == 0 and 2 * d >= best:
            return d
    return best


# ----------------------------------------------------------------------------
# Public wrapper (PyTorch NCHW contract).  No HBM relayouts: NCHW -> (B,C,H*W)
# is a free reshape, and the kernel writes the same layout back.
# ----------------------------------------------------------------------------
def gdfn_pallas(x_nchw, w_in, w_dw, w_out, *, tile_h=None, use_mxu=None,
                compute_dtype=jnp.bfloat16, approx_gelu=False):
    """GDFN forward.

    Args:
      x_nchw: (B, C, H, W) input (PyTorch layout); output dtype follows input.
      w_in:   (2*hid, C, 1, 1)  project_in weight (OIHW).
      w_dw:   (2*hid, 1, 3, 3)  depthwise 3x3 weight (OIHW, groups=2*hid).
      w_out:  (C, hid, 1, 1)    project_out weight (OIHW).
      tile_h: optional row-tile height (must divide H).
      use_mxu: force MXU matmuls (default: auto; VPU FMAs for tiny channels).
      compute_dtype: MXU operand dtype (default bf16 — native on v5e/v6e/v7x);
        accumulation and all elementwise math stay float32.
      approx_gelu: use tanh-approx GELU (EUP) instead of PyTorch's exact erf.
    """
    B, C, H, W = x_nchw.shape
    C2 = w_in.shape[0]
    hid = C2 // 2
    assert w_in.shape == (C2, C, 1, 1)
    assert w_dw.shape == (C2, 1, 3, 3)
    assert w_out.shape == (C, hid, 1, 1)

    if use_mxu is None:
        use_mxu = (C > 8) or (hid > 16)

    TH = tile_h if tile_h is not None else _choose_tile_h(B, H, W, C, C2, hid)
    assert H % TH == 0, f"tile_h={TH} must divide H={H}"
    n_h = H // TH
    r = TH * W

    # Channels-on-sublanes / flattened-spatial-on-lanes: a pure reshape.
    x_flat = x_nchw.reshape(B, C, H * W)

    # Halo tensor: one image row above and below each row tile, with the image
    # border pre-zeroed (project_in has no bias, so zero rows reproduce the
    # conv's zero padding).  Shape (B, n_h, C, 2W) — tiny (2/TH of the input).
    zero_row = jnp.zeros((B, C, 1, W), x_nchw.dtype)
    if n_h > 1:
        tops = jnp.concatenate([zero_row, x_nchw[:, :, TH - 1:H - 1:TH, :]], axis=2)
        bots = jnp.concatenate([x_nchw[:, :, TH:H:TH, :], zero_row], axis=2)
    else:
        tops, bots = zero_row, zero_row
    halo = jnp.transpose(jnp.concatenate([tops, bots], axis=3), (0, 2, 1, 3))

    # Weights in matmul / per-tap form — no transposes needed in this layout.
    mm_dtype = compute_dtype if use_mxu else jnp.float32
    w_in_mat = w_in[:, :, 0, 0].astype(mm_dtype)                    # (C2, C)
    w_dw_mat = w_dw[:, 0, :, :].reshape(C2, 9).astype(jnp.float32)  # (C2, 9)
    w_out_mat = w_out[:, :, 0, 0].astype(mm_dtype)                  # (C, hid)

    kernel = partial(_gdfn_kernel, W=W, hid=hid, use_mxu=use_mxu,
                     approx_gelu=approx_gelu)

    est = _vmem_bytes_estimate(TH, W, C, C2, hid)
    cap = _vmem_capacity_bytes()
    vmem_limit = int(min(int(cap * 0.75), max(32 * 2**20, 3 * est)))

    out_flat = pl.pallas_call(
        kernel,
        out_shape=jax.ShapeDtypeStruct((B, C, H * W), x_nchw.dtype),
        grid_spec=pltpu.PrefetchScalarGridSpec(
            num_scalar_prefetch=0,
            grid=(B, n_h),
            in_specs=[
                # main tile: all channels x (TH*W) flattened spatial positions
                pl.BlockSpec((1, C, r), lambda b, h: (b, 0, h)),
                # halo rows for this tile (top | bottom), pre-zeroed at edges
                pl.BlockSpec((1, 1, C, 2 * W), lambda b, h: (b, h, 0, 0)),
                pl.BlockSpec((C2, C), lambda b, h: (0, 0)),
                pl.BlockSpec((C2, 9), lambda b, h: (0, 0)),
                pl.BlockSpec((C, hid), lambda b, h: (0, 0)),
            ],
            out_specs=pl.BlockSpec((1, C, r), lambda b, h: (b, 0, h)),
        ),
        compiler_params=pltpu.CompilerParams(
            dimension_semantics=("parallel", "parallel"),
            vmem_limit_bytes=vmem_limit),
    )(x_flat, halo, w_in_mat, w_dw_mat, w_out_mat)

    return out_flat.reshape(B, C, H, W)


# ----------------------------------------------------------------------------
# Pure-JAX reference (mirrors the PyTorch module) for correctness checks.
# ----------------------------------------------------------------------------
def gdfn_reference(x_nchw, w_in, w_dw, w_out):
    C2 = w_in.shape[0]
    dn = ("NCHW", "OIHW", "NCHW")
    y = lax.conv_general_dilated(x_nchw, w_in, (1, 1), "VALID",
                                 dimension_numbers=dn)
    y = lax.conv_general_dilated(y, w_dw, (1, 1), "SAME",
                                 feature_group_count=C2,
                                 dimension_numbers=dn)
    x1, x2 = jnp.split(y, 2, axis=1)
    g = jax.nn.gelu(x1, approximate=False) * x2
    return lax.conv_general_dilated(g, w_out, (1, 1), "VALID",
                                    dimension_numbers=dn)


if __name__ == "__main__":
    # Small shapes consistent with the module: channels=4, expansion_factor=2.
    B, C, H, W = 2, 4, 16, 16
    expansion_factor = 2
    hid = int(C * expansion_factor)            # 8
    C2 = 2 * hid                               # 16

    key = jax.random.PRNGKey(0)
    kx, k1, k2, k3 = jax.random.split(key, 4)

    x = jax.random.normal(kx, (B, C, H, W), jnp.float32)
    w_in = jax.random.normal(k1, (C2, C, 1, 1), jnp.float32) * (1.0 / math.sqrt(C))
    w_dw = jax.random.normal(k2, (C2, 1, 3, 3), jnp.float32) * (1.0 / 3.0)
    w_out = jax.random.normal(k3, (C, hid, 1, 1), jnp.float32) * (1.0 / math.sqrt(hid))

    ref = jax.block_until_ready(gdfn_reference(x, w_in, w_dw, w_out))

    # 1) Defaults: auto tile (whole image), tiny channels -> f32 VPU 1x1 path.
    out = jax.block_until_ready(gdfn_pallas(x, w_in, w_dw, w_out))
    assert out.shape == (B, C, H, W), out.shape
    assert jnp.allclose(out, ref, atol=1e-4, rtol=1e-4), \
        float(jnp.max(jnp.abs(out - ref)))

    # 2) Explicit row tiling (exercises the halo path) + MXU matmuls, f32 operands.
    out_t = jax.block_until_ready(
        gdfn_pallas(x, w_in, w_dw, w_out, tile_h=8, use_mxu=True,
                    compute_dtype=jnp.float32))
    assert jnp.allclose(out_t, ref, atol=1e-4, rtol=1e-4), \
        float(jnp.max(jnp.abs(out_t - ref)))

    # 3) Production-style path: MXU with bf16 operands (the default), f32
    #    accumulation and f32 depthwise / GELU / gating — loose tolerance.
    out_bf16 = jax.block_until_ready(
        gdfn_pallas(x, w_in, w_dw, w_out, tile_h=8, use_mxu=True))
    assert float(jnp.max(jnp.abs(out_bf16 - ref))) < 0.2, \
        float(jnp.max(jnp.abs(out_bf16 - ref)))

    print("KERNEL_OK")
</pallas_src>

<mosaic_0001>
module attributes {stable_mosaic.version = 11 : i64} {
  func.func @_gdfn_kernel(%arg0: i32, %arg1: i32, %arg2: memref<1x4x256xf32, #tpu.memory_space<vmem>>, %arg3: memref<1x1x4x32xf32, #tpu.memory_space<vmem>>, %arg4: memref<16x4xf32, #tpu.memory_space<vmem>>, %arg5: memref<16x9xf32, #tpu.memory_space<vmem>>, %arg6: memref<4x8xf32, #tpu.memory_space<vmem>>, %arg7: memref<1x4x256xf32, #tpu.memory_space<vmem>>) attributes {dimension_semantics = [#tpu.dimension_semantics<parallel>, #tpu.dimension_semantics<parallel>], iteration_bounds = array<i64: 2, 1>, scalar_prefetch = 0 : i64, scratch_operands = 0 : i64, tpu.core_type = #tpu.core_type<tc>, window_params = [{transform_indices = @transform_0, window_bounds = array<i64: 1, 4, 256>}, {transform_indices = @transform_1, window_bounds = array<i64: 1, 1, 4, 32>}, {pipeline_mode = #tpu.pipeline_mode<synchronous>, transform_indices = @transform_2, window_bounds = array<i64: 16, 4>}, {pipeline_mode = #tpu.pipeline_mode<synchronous>, transform_indices = @transform_3, window_bounds = array<i64: 16, 9>}, {pipeline_mode = #tpu.pipeline_mode<synchronous>, transform_indices = @transform_4, window_bounds = array<i64: 4, 8>}, {transform_indices = @transform_5, window_bounds = array<i64: 1, 4, 256>}]} {
    %c0 = arith.constant 0 : index
    %c0_0 = arith.constant 0 : index
    %c0_1 = arith.constant 0 : index
    %0 = vector.load %arg2[%c0, %c0_0, %c0_1] : memref<1x4x256xf32, #tpu.memory_space<vmem>>, vector<1x4x256xf32>
    %1 = vector.shape_cast %0 : vector<1x4x256xf32> to vector<4x256xf32>
    %c0_2 = arith.constant 0 : index
    %c0_3 = arith.constant 0 : index
    %c0_4 = arith.constant 0 : index
    %c0_5 = arith.constant 0 : index
    %2 = vector.load %arg3[%c0_2, %c0_3, %c0_4, %c0_5] : memref<1x1x4x32xf32, #tpu.memory_space<vmem>>, vector<1x1x4x32xf32>
    %3 = vector.shape_cast %2 : vector<1x1x4x32xf32> to vector<4x32xf32>
    %4 = vector.extract_strided_slice %3 {offsets = [0, 0], sizes = [4, 16], strides = [1, 1]} : vector<4x32xf32> to vector<4x16xf32>
    %5 = vector.extract_strided_slice %3 {offsets = [0, 16], sizes = [4, 16], strides = [1, 1]} : vector<4x32xf32> to vector<4x16xf32>
    %6 = tpu.concatenate %4, %1, %5 in 1 : vector<4x16xf32>, vector<4x256xf32>, vector<4x16xf32> -> vector<4x288xf32>
    %c0_6 = arith.constant 0 : index
    %c0_7 = arith.constant 0 : index
    %7 = vector.load %arg4[%c0_6, %c0_7] : memref<16x4xf32, #tpu.memory_space<vmem>>, vector<16x4xf32>
    %8 = vector.extract_strided_slice %7 {offsets = [0, 0], sizes = [16, 1], strides = [1, 1]} : vector<16x4xf32> to vector<16x1xf32>
    %9 = vector.extract_strided_slice %6 {offsets = [0, 0], sizes = [1, 288], strides = [1, 1]} : vector<4x288xf32> to vector<1x288xf32>
    %10 = vector.broadcast %8 : vector<16x1xf32> to vector<16x288xf32>
    %11 = vector.broadcast %9 : vector<1x288xf32> to vector<16x288xf32>
    %12 = arith.mulf %10, %11 : vector<16x288xf32>
    %13 = vector.extract_strided_slice %7 {offsets = [0, 1], sizes = [16, 1], strides = [1, 1]} : vector<16x4xf32> to vector<16x1xf32>
    %14 = vector.extract_strided_slice %6 {offsets = [1, 0], sizes = [1, 288], strides = [1, 1]} : vector<4x288xf32> to vector<1x288xf32>
    %15 = vector.broadcast %13 : vector<16x1xf32> to vector<16x288xf32>
    %16 = vector.broadcast %14 : vector<1x288xf32> to vector<16x288xf32>
    %17 = arith.mulf %15, %16 : vector<16x288xf32>
    %18 = arith.addf %12, %17 : vector<16x288xf32>
    %19 = vector.extract_strided_slice %7 {offsets = [0, 2], sizes = [16, 1], strides = [1, 1]} : vector<16x4xf32> to vector<16x1xf32>
    %20 = vector.extract_strided_slice %6 {offsets = [2, 0], sizes = [1, 288], strides = [1, 1]} : vector<4x288xf32> to vector<1x288xf32>
    %21 = vector.broadcast %19 : vector<16x1xf32> to vector<16x288xf32>
    %22 = vector.broadcast %20 : vector<1x288xf32> to vector<16x288xf32>
    %23 = arith.mulf %21, %22 : vector<16x288xf32>
    %24 = arith.addf %18, %23 : vector<16x288xf32>
    %25 = vector.extract_strided_slice %7 {offsets = [0, 3], sizes = [16, 1], strides = [1, 1]} : vector<16x4xf32> to vector<16x1xf32>
    %26 = vector.extract_strided_slice %6 {offsets = [3, 0], sizes = [1, 288], strides = [1, 1]} : vector<4x288xf32> to vector<1x288xf32>
    %27 = vector.broadcast %25 : vector<16x1xf32> to vector<16x288xf32>
    %28 = vector.broadcast %26 : vector<1x288xf32> to vector<16x288xf32>
    %29 = arith.mulf %27, %28 : vector<16x288xf32>
    %30 = arith.addf %24, %29 : vector<16x288xf32>
    %31 = vector.extract_strided_slice %30 {offsets = [0, 0], sizes = [16, 256], strides = [1, 1]} : vector<16x288xf32> to vector<16x256xf32>
    %c272_i32 = arith.constant 272 : i32
    %32 = tpu.dynamic_rotate %30 by %c272_i32 dim 1 : vector<16x288xf32>, i32 -> vector<16x288xf32>
    %33 = vector.extract_strided_slice %32 {offsets = [0, 0], sizes = [16, 256], strides = [1, 1]} : vector<16x288xf32> to vector<16x256xf32>
    %c256_i32 = arith.constant 256 : i32
    %34 = tpu.dynamic_rotate %30 by %c256_i32 dim 1 : vector<16x288xf32>, i32 -> vector<16x288xf32>
    %35 = vector.extract_strided_slice %34 {offsets = [0, 0], sizes = [16, 256], strides = [1, 1]} : vector<16x288xf32> to vector<16x256xf32>
    %c0_8 = arith.constant 0 : index
    %c0_9 = arith.constant 0 : index
    %36 = vector.load %arg5[%c0_8, %c0_9] : memref<16x9xf32, #tpu.memory_space<vmem>>, vector<16x9xf32>
    %37 = vector.extract_strided_slice %36 {offsets = [0, 0], sizes = [16, 1], strides = [1, 1]} : vector<16x9xf32> to vector<16x1xf32>
    %38 = vector.broadcast %37 : vector<16x1xf32> to vector<16x256xf32>
    %39 = arith.mulf %38, %31 : vector<16x256xf32>
    %40 = vector.extract_strided_slice %36 {offsets = [0, 3], sizes = [16, 1], strides = [1, 1]} : vector<16x9xf32> to vector<16x1xf32>
    %41 = vector.broadcast %40 : vector<16x1xf32> to vector<16x256xf32>
    %42 = arith.mulf %41, %33 : vector<16x256xf32>
    %43 = arith.addf %39, %42 : vector<16x256xf32>
    %44 = vector.extract_strided_slice %36 {offsets = [0, 6], sizes = [16, 1], strides = [1, 1]} : vector<16x9xf32> to vector<16x1xf32>
    %45 = vector.broadcast %44 : vector<16x1xf32> to vector<16x256xf32>
    %46 = arith.mulf %45, %35 : vector<16x256xf32>
    %47 = arith.addf %43, %46 : vector<16x256xf32>
    %48 = vector.extract_strided_slice %36 {offsets = [0, 1], sizes = [16, 1], strides = [1, 1]} : vector<16x9xf32> to vector<16x1xf32>
    %49 = vector.broadcast %48 : vector<16x1xf32> to vector<16x256xf32>
    %50 = arith.mulf %49, %31 : vector<16x256xf32>
    %51 = vector.extract_strided_slice %36 {offsets = [0, 4], sizes = [16, 1], strides = [1, 1]} : vector<16x9xf32> to vector<16x1xf32>
    %52 = vector.broadcast %51 : vector<16x1xf32> to vector<16x256xf32>
    %53 = arith.mulf %52, %33 : vector<16x256xf32>
    %54 = arith.addf %50, %53 : vector<16x256xf32>
    %55 = vector.extract_strided_slice %36 {offsets = [0, 7], sizes = [16, 1], strides = [1, 1]} : vector<16x9xf32> to vector<16x1xf32>
    %56 = vector.broadcast %55 : vector<16x1xf32> to vector<16x256xf32>
    %57 = arith.mulf %56, %35 : vector<16x256xf32>
    %58 = arith.addf %54, %57 : vector<16x256xf32>
    %59 = vector.extract_strided_slice %36 {offsets = [0, 2], sizes = [16, 1], strides = [1, 1]} : vector<16x9xf32> to vector<16x1xf32>
    %60 = vector.broadcast %59 : vector<16x1xf32> to vector<16x256xf32>
    %61 = arith.mulf %60, %31 : vector<16x256xf32>
    %62 = vector.extract_strided_slice %36 {offsets = [0, 5], sizes = [16, 1], strides = [1, 1]} : vector<16x9xf32> to vector<16x1xf32>
    %63 = vector.broadcast %62 : vector<16x1xf32> to vector<16x256xf32>
    %64 = arith.mulf %63, %33 : vector<16x256xf32>
    %65 = arith.addf %61, %64 : vector<16x256xf32>
    %66 = vector.extract_strided_slice %36 {offsets = [0, 8], sizes = [16, 1], strides = [1, 1]} : vector<16x9xf32> to vector<16x1xf32>
    %67 = vector.broadcast %66 : vector<16x1xf32> to vector<16x256xf32>
    %68 = arith.mulf %67, %35 : vector<16x256xf32>
    %69 = arith.addf %65, %68 : vector<16x256xf32>
    %70 = tpu.iota {dimensions = array<i32: 1>} : vector<1x256xi32>
    %c15_i32 = arith.constant 15 : i32
    %71 = vector.broadcast %c15_i32 : i32 to vector<1x256xi32>
    %72 = arith.andi %70, %71 : vector<1x256xi32>
    %c0_i32 = arith.constant 0 : i32
    %73 = vector.broadcast %c0_i32 : i32 to vector<1x256xi32>
    %74 = arith.cmpi ne, %72, %73 : vector<1x256xi32>
    %75 = arith.extui %74 : vector<1x256xi1> to vector<1x256xi32>
    %76 = arith.sitofp %75 : vector<1x256xi32> to vector<1x256xf32>
    %c15_i32_10 = arith.constant 15 : i32
    %77 = vector.broadcast %c15_i32_10 : i32 to vector<1x256xi32>
    %78 = arith.cmpi ne, %72, %77 : vector<1x256xi32>
    %79 = arith.extui %78 : vector<1x256xi1> to vector<1x256xi32>
    %80 = arith.sitofp %79 : vector<1x256xi32> to vector<1x256xf32>
    %c1_i32 = arith.constant 1 : i32
    %81 = tpu.dynamic_rotate %47 by %c1_i32 dim 1 : vector<16x256xf32>, i32 -> vector<16x256xf32>
    %82 = vector.broadcast %76 : vector<1x256xf32> to vector<16x256xf32>
    %83 = arith.mulf %81, %82 : vector<16x256xf32>
    %84 = arith.addf %58, %83 : vector<16x256xf32>
    %c255_i32 = arith.constant 255 : i32
    %85 = tpu.dynamic_rotate %69 by %c255_i32 dim 1 : vector<16x256xf32>, i32 -> vector<16x256xf32>
    %86 = vector.broadcast %80 : vector<1x256xf32> to vector<16x256xf32>
    %87 = arith.mulf %85, %86 : vector<16x256xf32>
    %88 = arith.addf %84, %87 : vector<16x256xf32>
    %89 = vector.extract_strided_slice %88 {offsets = [0, 0], sizes = [8, 256], strides = [1, 1]} : vector<16x256xf32> to vector<8x256xf32>
    %90 = vector.extract_strided_slice %88 {offsets = [8, 0], sizes = [8, 256], strides = [1, 1]} : vector<16x256xf32> to vector<8x256xf32>
    %cst = arith.constant 5.000000e-01 : f32
    %91 = vector.broadcast %cst : f32 to vector<8x256xf32>
    %92 = arith.mulf %91, %89 : vector<8x256xf32>
    %cst_11 = arith.constant 0.707106769 : f32
    %93 = vector.broadcast %cst_11 : f32 to vector<8x256xf32>
    %94 = arith.mulf %89, %93 : vector<8x256xf32>
    %95 = math.erf %94 : vector<8x256xf32>
    %cst_12 = arith.constant 1.000000e+00 : f32
    %96 = vector.broadcast %cst_12 : f32 to vector<8x256xf32>
    %97 = arith.addf %96, %95 : vector<8x256xf32>
    %98 = arith.mulf %92, %97 : vector<8x256xf32>
    %99 = arith.mulf %98, %90 : vector<8x256xf32>
    %c0_13 = arith.constant 0 : index
    %c0_14 = arith.constant 0 : index
    %100 = vector.load %arg6[%c0_13, %c0_14] : memref<4x8xf32, #tpu.memory_space<vmem>>, vector<4x8xf32>
    %101 = vector.extract_strided_slice %100 {offsets = [0, 0], sizes = [4, 1], strides = [1, 1]} : vector<4x8xf32> to vector<4x1xf32>
    %102 = vector.extract_strided_slice %99 {offsets = [0, 0], sizes = [1, 256], strides = [1, 1]} : vector<8x256xf32> to vector<1x256xf32>
    %103 = vector.broadcast %101 : vector<4x1xf32> to vector<4x256xf32>
    %104 = vector.broadcast %102 : vector<1x256xf32> to vector<4x256xf32>
    %105 = arith.mulf %103, %104 : vector<4x256xf32>
    %106 = vector.extract_strided_slice %100 {offsets = [0, 1], sizes = [4, 1], strides = [1, 1]} : vector<4x8xf32> to vector<4x1xf32>
    %107 = vector.extract_strided_slice %99 {offsets = [1, 0], sizes = [1, 256], strides = [1, 1]} : vector<8x256xf32> to vector<1x256xf32>
    %108 = vector.broadcast %106 : vector<4x1xf32> to vector<4x256xf32>
    %109 = vector.broadcast %107 : vector<1x256xf32> to vector<4x256xf32>
    %110 = arith.mulf %108, %109 : vector<4x256xf32>
    %111 = arith.addf %105, %110 : vector<4x256xf32>
    %112 = vector.extract_strided_slice %100 {offsets = [0, 2], sizes = [4, 1], strides = [1, 1]} : vector<4x8xf32> to vector<4x1xf32>
    %113 = vector.extract_strided_slice %99 {offsets = [2, 0], sizes = [1, 256], strides = [1, 1]} : vector<8x256xf32> to vector<1x256xf32>
    %114 = vector.broadcast %112 : vector<4x1xf32> to vector<4x256xf32>
    %115 = vector.broadcast %113 : vector<1x256xf32> to vector<4x256xf32>
    %116 = arith.mulf %114, %115 : vector<4x256xf32>
    %117 = arith.addf %111, %116 : vector<4x256xf32>
    %118 = vector.extract_strided_slice %100 {offsets = [0, 3], sizes = [4, 1], strides = [1, 1]} : vector<4x8xf32> to vector<4x1xf32>
    %119 = vector.extract_strided_slice %99 {offsets = [3, 0], sizes = [1, 256], strides = [1, 1]} : vector<8x256xf32> to vector<1x256xf32>
    %120 = vector.broadcast %118 : vector<4x1xf32> to vector<4x256xf32>
    %121 = vector.broadcast %119 : vector<1x256xf32> to vector<4x256xf32>
    %122 = arith.mulf %120, %121 : vector<4x256xf32>
    %123 = arith.addf %117, %122 : vector<4x256xf32>
    %124 = vector.extract_strided_slice %100 {offsets = [0, 4], sizes = [4, 1], strides = [1, 1]} : vector<4x8xf32> to vector<4x1xf32>
    %125 = vector.extract_strided_slice %99 {offsets = [4, 0], sizes = [1, 256], strides = [1, 1]} : vector<8x256xf32> to vector<1x256xf32>
    %126 = vector.broadcast %124 : vector<4x1xf32> to vector<4x256xf32>
    %127 = vector.broadcast %125 : vector<1x256xf32> to vector<4x256xf32>
    %128 = arith.mulf %126, %127 : vector<4x256xf32>
    %129 = arith.addf %123, %128 : vector<4x256xf32>
    %130 = vector.extract_strided_slice %100 {offsets = [0, 5], sizes = [4, 1], strides = [1, 1]} : vector<4x8xf32> to vector<4x1xf32>
    %131 = vector.extract_strided_slice %99 {offsets = [5, 0], sizes = [1, 256], strides = [1, 1]} : vector<8x256xf32> to vector<1x256xf32>
    %132 = vector.broadcast %130 : vector<4x1xf32> to vector<4x256xf32>
    %133 = vector.broadcast %131 : vector<1x256xf32> to vector<4x256xf32>
    %134 = arith.mulf %132, %133 : vector<4x256xf32>
    %135 = arith.addf %129, %134 : vector<4x256xf32>
    %136 = vector.extract_strided_slice %100 {offsets = [0, 6], sizes = [4, 1], strides = [1, 1]} : vector<4x8xf32> to vector<4x1xf32>
    %137 = vector.extract_strided_slice %99 {offsets = [6, 0], sizes = [1, 256], strides = [1, 1]} : vector<8x256xf32> to vector<1x256xf32>
    %138 = vector.broadcast %136 : vector<4x1xf32> to vector<4x256xf32>
    %139 = vector.broadcast %137 : vector<1x256xf32> to vector<4x256xf32>
    %140 = arith.mulf %138, %139 : vector<4x256xf32>
    %141 = arith.addf %135, %140 : vector<4x256xf32>
    %142 = vector.extract_strided_slice %100 {offsets = [0, 7], sizes = [4, 1], strides = [1, 1]} : vector<4x8xf32> to vector<4x1xf32>
    %143 = vector.extract_strided_slice %99 {offsets = [7, 0], sizes = [1, 256], strides = [1, 1]} : vector<8x256xf32> to vector<1x256xf32>
    %144 = vector.broadcast %142 : vector<4x1xf32> to vector<4x256xf32>
    %145 = vector.broadcast %143 : vector<1x256xf32> to vector<4x256xf32>
    %146 = arith.mulf %144, %145 : vector<4x256xf32>
    %147 = arith.addf %141, %146 : vector<4x256xf32>
    %c0_15 = arith.constant 0 : index
    %c0_16 = arith.constant 0 : index
    %c0_17 = arith.constant 0 : index
    %148 = vector.load %arg7[%c0_15, %c0_16, %c0_17] : memref<1x4x256xf32, #tpu.memory_space<vmem>>, vector<1x4x256xf32>
    %149 = vector.shape_cast %148 : vector<1x4x256xf32> to vector<4x256xf32>
    %150 = vector.shape_cast %147 : vector<4x256xf32> to vector<1x4x256xf32>
    tpu.vector_store %arg7[%c0_15, %c0_16, %c0_17], %150 {strides = array<i32>} : memref<1x4x256xf32, #tpu.memory_space<vmem>>, vector<1x4x256xf32>,
    return
  }
  func.func @transform_0(%arg0: i32, %arg1: i32) -> (i32, i32, i32) {
    %c0_i32 = arith.constant 0 : i32
    %c0_i32_0 = arith.constant 0 : i32
    return %arg0, %c0_i32, %arg1 : i32, i32, i32
  }
  func.func @transform_1(%arg0: i32, %arg1: i32) -> (i32, i32, i32, i32) {
    %c0_i32 = arith.constant 0 : i32
    %c0_i32_0 = arith.constant 0 : i32
    %c0_i32_1 = arith.constant 0 : i32
    return %arg0, %arg1, %c0_i32, %c0_i32_0 : i32, i32, i32, i32
  }
  func.func @transform_2(%arg0: i32, %arg1: i32) -> (i32, i32) {
    %c0_i32 = arith.constant 0 : i32
    %c0_i32_0 = arith.constant 0 : i32
    %c0_i32_1 = arith.constant 0 : i32
    return %c0_i32, %c0_i32_0 : i32, i32
  }
  func.func @transform_3(%arg0: i32, %arg1: i32) -> (i32, i32) {
    %c0_i32 = arith.constant 0 : i32
    %c0_i32_0 = arith.constant 0 : i32
    %c0_i32_1 = arith.constant 0 : i32
    return %c0_i32, %c0_i32_0 : i32, i32
  }
  func.func @transform_4(%arg0: i32, %arg1: i32) -> (i32, i32) {
    %c0_i32 = arith.constant 0 : i32
    %c0_i32_0 = arith.constant 0 : i32
    %c0_i32_1 = arith.constant 0 : i32
    return %c0_i32, %c0_i32_0 : i32, i32
  }
  func.func @transform_5(%arg0: i32, %arg1: i32) -> (i32, i32, i32) {
    %c0_i32 = arith.constant 0 : i32
    %c0_i32_0 = arith.constant 0 : i32
    return %arg0, %c0_i32, %arg1 : i32, i32, i32
  }
}

</mosaic_0001>

<bundles_post_ra>
// kernel: tpu_custom_call.1
= control target key start
LH: loop header
LB: loop body
LE: loop exit
PB: predicated region body
PF: predicated region fallthrough
CT: control target
= control target key end

     0   :  { %10 = vsyncpa [#allocation3], 0  ;;  %s1915_s0 = inlined_call_operand.vmem [shape: f32[2,4,256], index: 0, kind: input, shape index: {}]   ;;  %s1916_s1 = inlined_call_operand.hbm [shape: f32[2,1,4,32], index: 1, kind: input, shape index: {}]   ;;  %s1917_s2 = inlined_call_operand.vmem [shape: f32[16,4], index: 2, kind: input, shape index: {}]   ;;  %s1918_s3 = inlined_call_operand.hbm [shape: f32[16,9], index: 3, kind: input, shape index: {}]   ;;  %s1919_s4 = inlined_call_operand.vmem [shape: f32[4,8], index: 4, kind: input, shape index: {}]   ;;  %s1920_s5 = inlined_call_operand.hbm [shape: f32[2,4,256], index: 5, kind: output, shape index: {}]  }
   0x1   :  { %12 = vsyncpa [#allocation3 + $0x1], 0 }
   0x2   :  { %13 = vsyncpa [#allocation6], 0 }
   0x3   :  { %14 = vsyncpa [#allocation4], 0 }
   0x4   :  { %16 = vsyncpa [#allocation4 + $0x1], 0  ;;  %s1448_s18 = smov 0   ;;  %s1450_s19 = smov 0  }
   0x5   :  { %s1452_s20 = smov 0   ;;  %s1454_s21 = smov 0  }
   0x6   :  { %s1456_s22 = smov 0   ;;  %s1458_s23 = smov 0  }
   0x7 LB: > { %s1098_s24 = sadd.s32 4294967295, %s1397_s23   ;;  %p1100_p0 = scmp.ge.s32.totalorder %s1397_s23, 1  ;;  %s1397_s23 = sphi %s1458_s23, %s22_s23   ;;  %s1393_s22 = sphi %s1456_s22, %s1931_s22   ;;  %s1389_s21 = sphi %s1454_s21, %s1930_s21   ;;  %s1385_s20 = sphi %s1452_s20, %s1929_s20   ;;  %s1381_s19 = sphi %s1450_s19, %s1928_s19   ;;  %s1377_s18 = sphi %s1448_s18, %s1927_s18  }
   0x8   : > { %p1480_p1 = scmp.eq.s32.totalorder %s1098_s24, 0  ;;  %p186_p2 = scmp.lt.s32.totalorder %s1397_s23, 3 }
   0x9   : > { %s200_s28 = sshll.u32 %s1918_s3, 4  ;;  %s1399_s30 = smov [#allocation5]   ;;  %s201_s28 = int_to_ptr.hbm [resolvable:$true] %s200_s28 }
   0xa   : > { %p1488_p3 = pnand %p1100_p0, %p186_p2  ;;  %s202_s6 = sshll.u32 %s1399_s30, 4  ;;  %s203_s6 = int_to_ptr.vmem [resolvable:$true] %s202_s6 }
   0xb   : > { %p1102_p6 = scmp.ge.s32.totalorder %s1397_s23, 2  ;;  %s1400_s7 = smov 128  }
   0xc   : > { %p1132_p4 = pneg %p1488_p3  ;;  %s1401_s8 = smov 8  }
   0xd   : > { %s1099_s9 = sadd.s32 4294967294, %s1397_s23   ;;  %s34_s10 = sadd.s32 1, %s1393_s22 }
   0xe   : > { %p1133_p5 = pnand %p1132_p4, %p1480_p1  ;;  %s71_s11 = sadd.s32 1, %s1385_s20 }
   0xf   : > { %p36_p7 = scmp.ge.s32.totalorder %s34_s10, 2  ;;  %p78_p8 = scmp.ne.s32.totalorder %s1385_s20, %s1381_s19 }
  0x10   : > { %1135 = dma.hbm_to_vmem [thread:$0]  (!%p1133_p5), %s201_s28, 256, %s203_s6, [#allocation6], %s1400_s7, %s1400_s7, %s1401_s8  }
  0x11   : > { %p79_p9 = scmp.eq.s32.totalorder %s1397_s23, 0  ;;  %p84_p10 = scmp.ne.s32.totalorder %s1381_s19, %s1377_s18 }
  0x12   : > { %s1933_s10 = smov (%p36_p7, %s34_s10), 0  ;;  %p173_p13 = scmp.eq.s32.totalorder %s1098_s24, 1 }
  0x13   : > { %p1507_p11 = por %p79_p9, %p78_p8  ;;  %p1513_p12 = por %p1480_p1, %p84_p10 }
  0x14   : > { %s66_s14 = ssub.s32 %s1393_s22, %s1933_s10  ;;  %p179_p2 = scmp.eq.s32.totalorder %s1099_s9, 1 }
  0x15   : > { %p69_p0 = scmp.eq.s32.totalorder %s66_s14, 0  ;;  %p1519_p4 = por %p173_p13, %p78_p8 }
  0x16   : > { %p1145_p5 = scmp.lt.s32.totalorder %s1397_s23, 2  ;;  %p1527_p7 = por %p179_p2, %p84_p10 }
  0x17   : > { %s1525_s16 = scalar_select %p69_p0, %s1385_s20, %s71_s11  }
  0x18   : > { %s232_s26 = sand.u32 1, %s1385_s20   ;;  %s1104_s28 = sshll.u32 %s1393_s22, 2 }
  0x19   : > { %s1103_s27 = sshll.u32 %s232_s26, 2  ;;  %s241_s24 = scalar_lea.hbm %s1916_s1, %s1104_s28 }
  0x1a   : > { %s236_s7 = scalar_lea.vmem [#allocation2], %s1103_s27  ;;  %s243_s9 = sshll.u32 %s241_s24, 4  ;;  %s244_s9 = int_to_ptr.hbm [resolvable:$true] %s243_s9 }
  0x1b   : > { %s245_s8 = sshll.u32 %s236_s7, 4  ;;  %p1137_p8 = pnand %p1145_p5, %p1507_p11  ;;  %s246_s8 = int_to_ptr.vmem [resolvable:$true] %s245_s8 }
  0x1c   : > { %s233_s11 = scalar_lea.sflag [#allocation3], %s232_s26  ;;  %254 = sbr.rel (%p1488_p3) target bundleno = 723 (0x2d3), region = 40 }
  0x1d   : > { %1139 = dma.hbm_to_vmem [thread:$0]  (!%p1137_p8), %s244_s9, 64, %s246_s8, %s233_s11  }
  0x1e   : > { %s1541_s14 = sand.u32 (!%p1488_p3), 1, %s1381_s19  }
  0x1f   : > { %s1106_s30 = sshll.u32 (!%p1488_p3), %s1541_s14, 2  ;;  %s257_s28 = scalar_lea.sflag (!%p1488_p3), [#allocation3], %s1541_s14 }
  0x20   : > { %s1545_s27 = scalar_lea.vmem (!%p1488_p3), [#allocation2], %s1106_s30 }
  0x21   : > { %1364 = dma.done.wait (%p1513_p12), %s257_s28, 64  }
  0x22   : > { %1366 = vsyncadd (%p1513_p12), %s257_s28, 4294967232 }
  0x23   : > { %1368 = dma.done.wait (%p1480_p1), [#allocation6], 256  }
  0x24   : > { %1370 = vsyncadd (%p1480_p1), [#allocation6], 4294967040  ;;  %p303_p3 = scmp.lt.s32.totalorder %s1389_s21, 1  ;;  %v1402_v0 = vmov 0   ;;  %v1403_v1 = vmov 1   ;;  %v1404_v2 = vmov 2  }
  0x25   : > { %1215 = vset.pattern.permute.xlu1 %v1402_v0  ;;  %1216 = vset.pattern.permute.xlu2 %v1403_v1  ;;  %v330_v3 = vld [vmem:[%s1917_s2] sm:$0xff]  ;;  %v331_v5 = vld [vmem:[%s1917_s2 + $0x8] sm:$0xff]  ;;  %s1405_s9 = smov 16   ;;  %v1406_v8 = vmov 3   ;;  %v1570_v9 = vld [vmem:[#allocation5 + $0x8] sm:$0xff]  ;;  %v1407_v11 = vmov 5  }
  0x26   : > { %s304_s29 = scalar_select %p303_p3, %s1389_s21, 1  ;;  %1217 = vset.pattern.permute.xlu0 %v1404_v2  ;;  %334 = vperm.xlu1 %1215, %v330_v3   ;;  %v1574_v10 = vld [vmem:[#allocation5] sm:$0xff]  ;;  %v1408_v12 = vmov 6   ;;  %v1409_v13 = vmov 4   ;;  %v1410_v14 = vmov 8   ;;  %vm323_vm0 = vcmask 130048  }
  0x27   : > { %352 = vperm.xlu2 %1216, %v330_v3   ;;  %v314_v19 = vld [vmem:[%s1545_s27] sm:$0xf]  ;;  %s1411_s11 = smov 32   ;;  %s1412_s30 = smov 112   ;;  %vm420_vm1 = vcmask 1047808   ;;  %vm475_vm2 = vcmask 916480  }
  0x28   : > { %s1122_s12 = sshll.u32 %s304_s29, 3  ;;  %s1414_s28 = smov 96   ;;  %vm520_vm3 = vcmask 785408  }
  0x29   : > { %s310_s6 = scalar_lea.vmem %s1915_s0, %s1122_s12  ;;  %s1415_s27 = smov 1  }
  0x2a   : > { %v313_v4 = vld [vmem:[%s310_s6] sm:$0xff]  ;;  %s1416_s29 = smov 127   ;;  %s1108_s26 = sshll.u32 %s1541_s14, 3 }
  0x2b   : > { %316 = vst [vmem:[#allocation1] ss:$2 sm:$0xff] %v313_v4  ;;  %s1123_s6 = sshll.u32 %s1389_s21, 3  ;;  %s301_s8 = scalar_lea.vmem [#allocation7], %s1108_s26 }
  0x2c   : > { %s983_s7 = scalar_lea.hbm %s1920_s5, %s1123_s6  ;;  %s1331_s12 = scalar_lea.hbm %s1920_s5, 16 }
  0x2d   : > { %s987_s21 = sshll.u32 %s983_s7, 4  ;;  %s988_s21 = int_to_ptr.hbm [resolvable:$true] %s987_s21 }
  0x2e   : > { %339 = vperm.xlu1 %1215, %v331_v5  }
  0x2f   : > { %356 = vperm.xlu2 %1216, %v331_v5  }
  0x32   : > { %v317_v6 = vld.sshfl [vmem:[#allocation1] sm:$0xff pattern:$0x75316420]  ;;  %v318_v7 = vld.sshfl [vmem:[#allocation1 + $0x8] sm:$0xff pattern:$0x75316420] }
  0x33   : > { %319 = vrot.lane.b32.xlu0 %v317_v6, %s1405_s9 }
  0x36   : > { %1218 = vset.pattern.permute.xlu1 %v1404_v2 }
  0x37   : > { %1219 = vset.pattern.permute.xlu2 %v1406_v8  ;;  %379 = vperm.xlu1 %1218, %v331_v5  }
  0x38   : > { %398 = vperm.xlu2 %1219, %v330_v3  }
  0x3b   : > { %321 = vrot.lane.b32.xlu0 %v318_v7, %s1405_s9  ;;  %s985_s9 = sshll.u32 %s301_s8, 4  ;;  %s986_s9 = int_to_ptr.vmem [resolvable:$true] %s985_s9 }
  0x3f   : > { %1220 = vset.pattern.permute.xlu1 %v1406_v8 }
  0x40   : > { %1222 = vset.pattern.permute.xlu2 %v1402_v0  ;;  %402 = vperm.xlu1 %1220, %v331_v5  }
  0x41   : > { %436 = vperm.xlu2 %1222, %v1570_v9  }
  0x43   : > { %375 = vperm.xlu0 %1217, %v330_v3  }
  0x48   : > { %1221 = vset.pattern.permute.xlu1 %v1402_v0 }
  0x49   : > { %1229 = vset.pattern.permute.xlu2 %v1407_v11  ;;  %431 = vperm.xlu1 %1221, %v1574_v10  }
  0x4a   : > { %646 = vperm.xlu2 %1229, %v1574_v10  }
  0x4b   : > { %1223 = vset.pattern.permute.xlu0 %v1406_v8 }
  0x4c   : > { %444 = vperm.xlu0 %1223, %v1574_v10  }
  0x51   : > { %1224 = vset.pattern.permute.xlu1 %v1406_v8 }
  0x52   : > { %1231 = vset.pattern.permute.xlu2 %v1409_v13  ;;  %448 = vperm.xlu1 %1224, %v1570_v9  }
  0x53   : > { %546 = vperm.xlu2 %1231, %v1574_v10  }
  0x54   : > { %1225 = vset.pattern.permute.xlu0 %v1408_v12 }
  0x55   : > { %489 = vperm.xlu0 %1225, %v1574_v10  }
  0x5a   : > { %1226 = vset.pattern.permute.xlu1 %v1408_v12 }
  0x5b   : > { %1233 = vset.pattern.permute.xlu2 %v1404_v2  ;;  %493 = vperm.xlu1 %1226, %v1570_v9  }
  0x5c   : > { %634 = vperm.xlu2 %1233, %v1574_v10  }
  0x5d   : > { %1227 = vset.pattern.permute.xlu0 %v1403_v1 }
  0x5e   : > { %534 = vperm.xlu0 %1227, %v1574_v10  }
  0x63   : > { %1228 = vset.pattern.permute.xlu1 %v1403_v1 }
  0x64   : > { %538 = vperm.xlu1 %1228, %v1570_v9   ;;  %1235 = vset.pattern.permute.xlu2 %v1407_v11 }
  0x66   : > { %1232 = vset.pattern.permute.xlu0 %v1409_v13 }
  0x67   : > { %550 = vperm.xlu0 %1232, %v1570_v9  }
  0x6c   : > { %1230 = vset.pattern.permute.xlu1 %v1410_v14 }
  0x6d   : > { %690 = vperm.xlu1 %1230, %v1574_v10  }
  0x75   : > { %1239 = vset.pattern.permute.xlu1 %v1402_v0 }
  0x81   : > { %v353_v16 = vpop.permute.xlu2 %352 }
  0x89   : > { %v357_v20 = vpop.permute.xlu2 %356 }
  0x92   : > { %v399_v47 = vpop.permute.xlu2 %398 }
  0x98   : > { %v335_v15 = vpop.permute.xlu1 %334 }
  0xa0   : > { %v1600_v17 = vpop.permute.xlu1 %339 }
  0xa5   : > { %v320_v18 = vpop.permute.xlu0 %319 }
  0xa6   : > { %v328_v21 = vsel %vm323_vm0, %v314_v19, %v320_v18 }
  0xa7   : > { %v342_v22 = vperm.slane %v328_v21, 0  ;;  %v359_v23 = vperm.slane %v328_v21, 1  ;;  %v382_v32 = vperm.slane %v328_v21, 2  ;;  %v405_v34 = vperm.slane %v328_v21, 3 }
  0xa9   : > { %v380_v27 = vpop.permute.xlu1 %379  ;;  %v348_v35 = vmul.f32 %v342_v22, %v1600_v17  ;;  %v365_v36 = vmul.f32 %v359_v23, %v357_v20  ;;  %v345_v39 = vmul.f32 %v342_v22, %v335_v15  ;;  %v362_v40 = vmul.f32 %v359_v23, %v353_v16  ;;  %v1623_v23 = vpop.permute.xlu2 %436 }
  0xaa   : > { %v388_v50 = vmul.f32 %v382_v32, %v380_v27  ;;  %v408_v3 = vmul.f32 %v405_v34, %v399_v47 }
  0xab   : > { %v371_v52 = vadd.f32 %v365_v36, %v348_v35  ;;  %v368_v56 = vadd.f32 %v362_v40, %v345_v39 }
  0xad   : > { %v322_v24 = vpop.permute.xlu0 %321  ;;  %v394_v63 = vadd.f32 %v388_v50, %v371_v52 }
  0xae   : > { %v1603_v25 = vsel %vm323_vm0, %v320_v18, %v322_v24  ;;  %v329_v26 = vsel %vm323_vm0, %v322_v24, %v314_v19 }
  0xaf   : > { %v343_v28 = vperm.slane %v1603_v25, 0  ;;  %v344_v29 = vperm.slane %v329_v26, 0  ;;  %v360_v30 = vperm.slane %v1603_v25, 1  ;;  %v361_v31 = vperm.slane %v329_v26, 1 }
  0xb0   : > { %v384_v33 = vperm.slane %v329_v26, 2  ;;  %v407_v46 = vperm.slane %v329_v26, 3  ;;  %v383_v49 = vperm.slane %v1603_v25, 2  ;;  %v406_v62 = vperm.slane %v1603_v25, 3 }
  0xb1   : > { %v347_v37 = vmul.f32 %v344_v29, %v335_v15  ;;  %v350_v38 = vmul.f32 %v344_v29, %v1600_v17  ;;  %v364_v41 = vmul.f32 %v361_v31, %v353_v16  ;;  %v367_v42 = vmul.f32 %v361_v31, %v357_v20 }
  0xb2   : > { %v346_v43 = vmul.f32 %v343_v28, %v335_v15  ;;  %v363_v44 = vmul.f32 %v360_v30, %v353_v16  ;;  %v390_v45 = vmul.f32 %v384_v33, %v380_v27  ;;  %v410_v54 = vmul.f32 %v407_v46, %v399_v47  ;;  %v403_v61 = vpop.permute.xlu1 %402 }
  0xb3   : > { %v373_v48 = vadd.f32 %v367_v42, %v350_v38  ;;  %v370_v51 = vadd.f32 %v364_v41, %v347_v37  ;;  %v411_v4 = vmul.f32 %v405_v34, %v403_v61  ;;  %v413_v7 = vmul.f32 %v407_v46, %v403_v61 }
  0xb4   : > { %v369_v59 = vadd.f32 %v363_v44, %v346_v43  ;;  %v409_v18 = vmul.f32 %v406_v62, %v399_v47  ;;  %v349_v24 = vmul.f32 %v343_v28, %v1600_v17  ;;  %v366_v25 = vmul.f32 %v360_v30, %v357_v20  ;;  %v1634_v17 = vpop.permute.xlu2 %646 }
  0xb5   : > { %v376_v53 = vpop.permute.xlu0 %375  ;;  %v396_v55 = vadd.f32 %v390_v45, %v373_v48  ;;  %v1613_v16 = vadd.f32 %v411_v4, %v394_v63  ;;  %v389_v34 = vmul.f32 %v383_v49, %v380_v27  ;;  %v412_v35 = vmul.f32 %v406_v62, %v403_v61 }
  0xb6   : > { %v385_v57 = vmul.f32 %v382_v32, %v376_v53  ;;  %v386_v58 = vmul.f32 %v383_v49, %v376_v53  ;;  %v387_v60 = vmul.f32 %v384_v33, %v376_v53  ;;  %v372_v32 = vadd.f32 %v366_v25, %v349_v24 }
  0xb7   : > { %v1615_v19 = vadd.f32 %v413_v7, %v396_v55  ;;  %423 = vrot.lane.b32.xlu0 %v1613_v16, %s1411_s11  ;;  %v1413_v28 = vmov 7  }
  0xb8   : > { %v391_v0 = vadd.f32 %v385_v57, %v368_v56  ;;  %v392_v5 = vadd.f32 %v386_v58, %v369_v59  ;;  %v393_v6 = vadd.f32 %v387_v60, %v370_v51  ;;  %v395_v36 = vadd.f32 %v389_v34, %v372_v32  ;;  %1234 = vset.pattern.permute.xlu0 %v1413_v28 }
  0xba   : > { %v1611_v15 = vadd.f32 %v408_v3, %v391_v0  ;;  %v1617_v21 = vadd.f32 %v410_v54, %v393_v6  ;;  %v1621_v22 = vadd.f32 %v409_v18, %v392_v5  ;;  %v1636_v20 = vadd.f32 %v412_v35, %v395_v36 }
  0xbb   : > { %v1627_v31 = vpop.permute.xlu1 %431 }
  0xbc   : > { %421 = vrot.lane.b32.xlu2 %v1611_v15, %s1411_s11  ;;  %v547_v41 = vpop.permute.xlu2 %546  ;;  %v653_v52 = vmul.f32 %v1634_v17, %v1611_v15  ;;  %v654_v55 = vmul.f32 %v1634_v17, %v1621_v22  ;;  %v439_v0 = vmul.f32 %v1627_v31, %v1611_v15  ;;  %s970_s11 = scalar_lea.sflag [#allocation4], %s1541_s14 }
  0xbd   : > { %v554_v45 = vmul.f32 %v547_v41, %v1621_v22  ;;  %v553_v51 = vmul.f32 %v547_v41, %v1611_v15 }
  0xbe   : > { %v445_v26 = vpop.permute.xlu0 %444 }
  0xbf   : > { %v452_v29 = vmul.f32 %v445_v26, %v1621_v22  ;;  %v451_v33 = vmul.f32 %v445_v26, %v1611_v15 }
  0xc1   : > { %465 = vrot.lane.b32.xlu1 %v452_v29, %s1412_s30 }
  0xc4   : > { %463 = vrot.lane.b32.xlu2 %v451_v33, %s1412_s30  ;;  %v449_v30 = vpop.permute.xlu1 %448  ;;  %v1679_v57 = vpop.permute.xlu2 %634 }
  0xc5   : > { %v454_v38 = vmul.f32 %v449_v30, %v1613_v16  ;;  %v455_v39 = vmul.f32 %v449_v30, %v1636_v20 }
  0xc7   : > { %v1632_v37 = vpop.permute.xlu0 %489  ;;  %469 = vrot.lane.b32.xlu0 %v454_v38, %s1412_s30 }
  0xc8   : > { %v496_v27 = vmul.f32 %v1632_v37, %v1611_v15  ;;  %v497_v42 = vmul.f32 %v1632_v37, %v1621_v22 }
  0xc9   : > { %471 = vrot.lane.b32.xlu1 %v455_v39, %s1412_s30 }
  0xcc   : > { %508 = vrot.lane.b32.xlu2 %v496_v27, %s1414_s28 }
  0xcd   : > { %v494_v43 = vpop.permute.xlu1 %493 }
  0xce   : > { %v499_v44 = vmul.f32 %v494_v43, %v1613_v16  ;;  %v500_v47 = vmul.f32 %v494_v43, %v1636_v20 }
  0xd0   : > { %v1646_v40 = vpop.permute.xlu0 %534  ;;  %514 = vrot.lane.b32.xlu0 %v499_v44, %s1414_s28 }
  0xd1   : > { %510 = vrot.lane.b32.xlu1 %v497_v42, %s1414_s28 }
  0xd4   : > { %567 = vrot.lane.b32.xlu2 %v554_v45, %s1412_s30 }
  0xd6   : > { %v1658_v50 = vpop.permute.xlu1 %538 }
  0xd7   : > { %v543_v38 = vmul.f32 %v1658_v50, %v1613_v16 }
  0xd9   : > { %v551_v46 = vpop.permute.xlu0 %550  ;;  %516 = vrot.lane.b32.xlu1 %v500_v47, %s1414_s28 }
  0xda   : > { %v556_v48 = vmul.f32 %v551_v46, %v1613_v16  ;;  %v557_v49 = vmul.f32 %v551_v46, %v1636_v20 }
  0xdc   : > { %571 = vrot.lane.b32.xlu2 %v556_v48, %s1412_s30  ;;  %573 = vrot.lane.b32.xlu0 %v557_v49, %s1412_s30 }
  0xdf   : > { %v691_v53 = vpop.permute.xlu1 %690 }
  0xe0   : > { %v698_v54 = vmul.f32 %v691_v53, %v1621_v22  ;;  %v697_v56 = vmul.f32 %v691_v53, %v1611_v15 }
  0xe1   : > { %565 = vrot.lane.b32.xlu1 %v553_v51, %s1412_s30 }
  0xe4   : > { %665 = vrot.lane.b32.xlu0 %v653_v52, %s1412_s30  ;;  %711 = vrot.lane.b32.xlu2 %v698_v54, %s1414_s28 }
  0xe9   : > { %667 = vrot.lane.b32.xlu1 %v654_v55, %s1412_s30 }
  0xec   : > { %590 = vperm.xlu0 %1234, %v1574_v10  }
  0xf1   : > { %709 = vrot.lane.b32.xlu1 %v697_v56, %s1414_s28 }
  0xf4   : > { %1236 = vset.pattern.permute.xlu0 %v1410_v14 }
  0xf5   : > { %694 = vperm.xlu0 %1236, %v1570_v9  }
  0xfd   : > { %1237 = vset.pattern.permute.xlu0 %v1404_v2 }
 0x116   : > { %v422_v58 = vpop.permute.xlu2 %421 }
 0x117   : > { %v1682_v59 = vsel %vm420_vm1, %v422_v58, %v1617_v21  ;;  %v441_v21 = vmul.f32 %v1623_v23, %v1613_v16 }
 0x118   : > { %v555_v60 = vmul.f32 %v547_v41, %v1682_v59  ;;  %v453_v10 = vmul.f32 %v445_v26, %v1682_v59  ;;  %v699_v6 = vmul.f32 %v691_v53, %v1682_v59  ;;  %v498_v7 = vmul.f32 %v1632_v37, %v1682_v59 }
 0x119   : > { %v655_v37 = vmul.f32 %v1634_v17, %v1682_v59  ;;  %v541_v17 = vmul.f32 %v1646_v40, %v1611_v15 }
 0x11a   : > { %569 = vrot.lane.b32.xlu1 %v555_v60, %s1412_s30  ;;  %467 = vrot.lane.b32.xlu2 %v453_v10, %s1412_s30  ;;  %v542_v10 = vmul.f32 %v1646_v40, %v1621_v22  ;;  %v544_v40 = vmul.f32 %v1658_v50, %v1636_v20 }
 0x11e   : > { %v464_v63 = vpop.permute.xlu2 %463 }
 0x126   : > { %v509_v18 = vpop.permute.xlu2 %508 }
 0x129   : > { %v424_v14 = vpop.permute.xlu0 %423 }
 0x12a   : > { %v1689_v61 = vsel %vm420_vm1, %v424_v14, %v1615_v19 }
 0x12b   : > { %v558_v2 = vmul.f32 %v551_v46, %v1689_v61  ;;  %v456_v62 = vmul.f32 %v449_v30, %v1689_v61  ;;  %v501_v29 = vmul.f32 %v494_v43, %v1689_v61 }
 0x12d   : > { %575 = vrot.lane.b32.xlu1 %v558_v2, %s1412_s30  ;;  %473 = vrot.lane.b32.xlu2 %v456_v62, %s1412_s30  ;;  %v442_v2 = vmul.f32 %v1623_v23, %v1636_v20 }
 0x12e   : > { %v568_v32 = vpop.permute.xlu2 %567 }
 0x133   : > { %v1697_v3 = vpop.permute.xlu1 %465 }
 0x134   : > { %v476_v4 = vsel %vm475_vm2, %v464_v63, %v1697_v3 }
 0x135   : > { %v484_v5 = vadd.f32 %v476_v4, %v439_v0  ;;  %713 = vrot.lane.b32.xlu1 %v699_v6, %s1414_s28  ;;  %512 = vrot.lane.b32.xlu2 %v498_v7, %s1414_s28 }
 0x136   : > { %v572_v39 = vpop.permute.xlu2 %571 }
 0x139   : > { %v470_v24 = vpop.permute.xlu0 %469 }
 0x13b   : > { %v472_v19 = vpop.permute.xlu1 %471 }
 0x13c   : > { %v478_v25 = vsel %vm475_vm2, %v470_v24, %v472_v19 }
 0x13d   : > { %v486_v26 = vadd.f32 %v478_v25, %v441_v21  ;;  %518 = vrot.lane.b32.xlu2 %v501_v29, %s1414_s28 }
 0x13e   : > { %v712_v56 = vpop.permute.xlu2 %711 }
 0x142   : > { %v515_v35 = vpop.permute.xlu0 %514 }
 0x143   : > { %v1711_v33 = vpop.permute.xlu1 %510 }
 0x144   : > { %v521_v34 = vsel %vm520_vm3, %v509_v18, %v1711_v33 }
 0x145   : > { %v529_v36 = vadd.f32 %v521_v34, %v484_v5  ;;  %669 = vrot.lane.b32.xlu2 %v655_v37, %s1412_s30  ;;  %v641_v37 = vmul.f32 %v1679_v57, %v1611_v15 }
 0x14b   : > { %v517_v30 = vpop.permute.xlu1 %516 }
 0x14c   : > { %v523_v27 = vsel %vm520_vm3, %v515_v35, %v517_v30 }
 0x14d   : > { %v1721_v42 = vadd.f32 %v523_v27, %v486_v26  ;;  %650 = vperm.xlu2 %1235, %v1570_v9  }
 0x14e   : > { %v574_v41 = vpop.permute.xlu0 %573 }
 0x14f   : > { %v579_v43 = vsel %vm475_vm2, %v572_v39, %v574_v41 }
 0x150   : > { %v1724_v44 = vadd.f32 %v579_v43, %v543_v38 }
 0x153   : > { %v566_v45 = vpop.permute.xlu1 %565 }
 0x154   : > { %v577_v46 = vsel %vm475_vm2, %v566_v45, %v568_v32 }
 0x155   : > { %v1730_v48 = vadd.f32 %v577_v46, %v541_v17  ;;  %1238 = vset.pattern.permute.xlu2 %v1413_v28 }
 0x156   : > { %v666_v47 = vpop.permute.xlu0 %665 }
 0x15b   : > { %v668_v55 = vpop.permute.xlu1 %667 }
 0x15c   : > { %v677_v50 = vsel %vm475_vm2, %v666_v47, %v668_v55 }
 0x15d   : > { %v685_v39 = vadd.f32 %v677_v50, %v641_v37 }
 0x15e   : > { %v591_v49 = vpop.permute.xlu0 %590 }
 0x15f   : > { %v597_v51 = vmul.f32 %v591_v49, %v1611_v15  ;;  %v598_v52 = vmul.f32 %v591_v49, %v1621_v22  ;;  %v599_v34 = vmul.f32 %v591_v49, %v1682_v59 }
 0x161   : > { %611 = vrot.lane.b32.xlu1 %v598_v52, %s1414_s28  ;;  %609 = vrot.lane.b32.xlu0 %v597_v51, %s1414_s28 }
 0x163   : > { %v710_v58 = vpop.permute.xlu1 %709 }
 0x164   : > { %v721_v38 = vsel %vm520_vm3, %v710_v58, %v712_v56 }
 0x167   : > { %v695_v53 = vpop.permute.xlu0 %694 }
 0x168   : > { %v700_v54 = vmul.f32 %v695_v53, %v1613_v16  ;;  %v701_v46 = vmul.f32 %v695_v53, %v1636_v20 }
 0x169   : > { %638 = vperm.xlu0 %1237, %v1570_v9  }
 0x171   : > { %715 = vrot.lane.b32.xlu0 %v700_v54, %s1414_s28 }
 0x174   : > { %v468_v60 = vpop.permute.xlu2 %467 }
 0x175   : > { %v477_v35 = vsel %vm475_vm2, %v1697_v3, %v468_v60 }
 0x187   : > { %v474_v62 = vpop.permute.xlu2 %473 }
 0x188   : > { %v479_v0 = vsel %vm475_vm2, %v472_v19, %v474_v62 }
 0x189   : > { %v487_v5 = vadd.f32 %v479_v0, %v442_v2 }
 0x18c   : > { %v570_v14 = vpop.permute.xlu1 %569 }
 0x18d   : > { %v578_v63 = vsel %vm475_vm2, %v568_v32, %v570_v14 }
 0x18e   : > { %v586_v4 = vadd.f32 %v578_v63, %v542_v10 }
 0x18f   : > { %v513_v6 = vpop.permute.xlu2 %512 }
 0x190   : > { %v522_v59 = vsel %vm520_vm3, %v1711_v33, %v513_v6 }
 0x197   : > { %v519_v7 = vpop.permute.xlu2 %518 }
 0x198   : > { %v524_v18 = vsel %vm520_vm3, %v517_v30, %v519_v7  ;;  %v440_v30 = vmul.f32 %v1627_v31, %v1621_v22  ;;  %v642_v31 = vmul.f32 %v1679_v57, %v1621_v22  ;;  %v702_v22 = vmul.f32 %v695_v53, %v1689_v61 }
 0x199   : > { %v1747_v21 = vadd.f32 %v524_v18, %v487_v5 }
 0x19a   : > { %v485_v27 = vadd.f32 %v477_v35, %v440_v30 }
 0x19f   : > { %v576_v24 = vpop.permute.xlu1 %575  ;;  %v670_v25 = vpop.permute.xlu2 %669 }
 0x1a0   : > { %v580_v23 = vsel %vm475_vm2, %v574_v41, %v576_v24  ;;  %v729_v41 = vadd.f32 %v721_v38, %v685_v39  ;;  %v678_v15 = vsel %vm475_vm2, %v668_v55, %v670_v25  ;;  %v882_v39 = vld [vmem:[%s1919_s4] sm:$0xf] }
 0x1a1   : > { %v1752_v26 = vadd.f32 %v580_v23, %v544_v40  ;;  %v686_v17 = vadd.f32 %v678_v15, %v642_v31 }
 0x1a7   : > { %v651_v29 = vpop.permute.xlu2 %650  ;;  %v714_v43 = vpop.permute.xlu1 %713 }
 0x1a8   : > { %v656_v19 = vmul.f32 %v651_v29, %v1613_v16  ;;  %v657_v32 = vmul.f32 %v651_v29, %v1636_v20  ;;  %v722_v3 = vsel %vm520_vm3, %v712_v56, %v714_v43  ;;  %v658_v33 = vmul.f32 %v651_v29, %v1689_v61 }
 0x1a9   : > { %v730_v45 = vadd.f32 %v722_v3, %v686_v17  ;;  %v733_v56 = vlaneseq }
 0x1aa   : > { %673 = vrot.lane.b32.xlu2 %v657_v32, %s1412_s30  ;;  %671 = vrot.lane.b32.xlu1 %v656_v19, %s1412_s30 }
 0x1ab   : > { %v1791_v60 = vand.u32 127, %v733_v56 }
 0x1ad   : > { %v735_v53 = vadd.s32 128, %v1791_v60  ;;  %v736_v2 = vand.u32 15, %v1791_v60  ;;  %vm758_vm6 = vcmp.lt.s32.totalorder %v1791_v60, 1  ;;  %vm779_vm9 = vcmp.lt.s32.totalorder %v1791_v60, 127 }
 0x1af   : > { %v737_v14 = vand.u32 15, %v735_v53  ;;  %vm738_vm5 = vcmp.ne.s32.totalorder %v736_v2, 0  ;;  %vm744_vm7 = vcmp.ne.s32.totalorder %v736_v2, 15 }
 0x1b1   : > { %vm739_vm4 = vcmp.ne.s32.totalorder %v737_v14, 0  ;;  %vm745_vm8 = vcmp.ne.s32.totalorder %v737_v14, 15 }
 0x1b2   : > { %613 = vrot.lane.b32.xlu2 %v599_v34, %s1414_s28  ;;  %750 = vrot.lane.b32.xlu1 %v529_v36, %s1415_s27  ;;  %v530_v36 = vadd.f32 %v522_v59, %v485_v27 }
 0x1ba   : > { %754 = vrot.lane.b32.xlu2 %v530_v36, %s1415_s27  ;;  %771 = vrot.lane.b32.xlu1 %v729_v41, %s1416_s29 }
 0x1c2   : > { %775 = vrot.lane.b32.xlu2 %v730_v45, %s1416_s29  ;;  %675 = vrot.lane.b32.xlu1 %v658_v33, %s1412_s30  ;;  %s1325_s30 = sshra.s32 %s988_s21, 4  ;;  %s1326_s30 = int_to_ptr.hbm [resolvable:$true] %s1325_s30 }
 0x1c3   : > { %p1332_p11 = scmp.lt.s32.totalorder %s1326_s30, %s1920_s5 }
 0x1ca   : > { %594 = vperm.xlu2 %1238, %v1570_v9   ;;  %717 = vrot.lane.b32.xlu1 %v701_v46, %s1414_s28 }
 0x1d2   : > { %719 = vrot.lane.b32.xlu2 %v702_v22, %s1414_s28 }
 0x1d3   : > { %v612_v47 = vpop.permute.xlu1 %611  ;;  %v610_v49 = vpop.permute.xlu0 %609  ;;  %1240 = vset.pattern.permute.xlu2 %v1403_v1  ;;  %v1417_v1 = vmov 0.0  }
 0x1d4   : > { %v621_v57 = vsel %vm520_vm3, %v610_v49, %v612_v47  ;;  %v1798_v63 = vsel %vm738_vm5, 1.0, %v1417_v1  ;;  %v1813_v23 = vsel %vm745_vm8, 1.0, %v1417_v1 }
 0x1d5   : > { %v629_v51 = vadd.f32 %v621_v57, %v1730_v48 }
 0x1da   : > { %752 = vrot.lane.b32.xlu2 %v1721_v42, %s1415_s27  ;;  %v1796_v42 = vsel %vm739_vm4, 1.0, %v1417_v1 }
 0x1db   : > { %v639_v38 = vpop.permute.xlu0 %638 }
 0x1dc   : > { %v643_v41 = vmul.f32 %v639_v38, %v1613_v16  ;;  %v644_v43 = vmul.f32 %v639_v38, %v1636_v20 }
 0x204   : > { %v674_v52 = vpop.permute.xlu2 %673 }
 0x20c   : > { %v614_v54 = vpop.permute.xlu2 %613 }
 0x20d   : > { %v622_v9 = vsel %vm520_vm3, %v612_v47, %v614_v54 }
 0x20e   : > { %v630_v55 = vadd.f32 %v622_v9, %v586_v4 }
 0x214   : > { %v755_v58 = vpop.permute.xlu2 %754 }
 0x21c   : > { %v776_v10 = vpop.permute.xlu2 %775  ;;  %v672_v48 = vpop.permute.xlu1 %671 }
 0x21d   : > { %v679_v27 = vsel %vm475_vm2, %v672_v48, %v674_v52 }
 0x21e   : > { %v687_v15 = vadd.f32 %v679_v27, %v643_v41 }
 0x224   : > { %v595_v62 = vpop.permute.xlu2 %594  ;;  %v751_v0 = vpop.permute.xlu1 %750 }
 0x225   : > { %v601_v4 = vmul.f32 %v595_v62, %v1636_v20  ;;  %v602_v5 = vmul.f32 %v595_v62, %v1689_v61  ;;  %v759_v6 = vsel %vm758_vm6, %v751_v0, %v755_v58  ;;  %v761_v7 = vsel %vm758_vm6, %v755_v58, %v751_v0 }
 0x226   : > { %v764_v18 = vmul.f32 %v1796_v42, %v759_v6  ;;  %v763_v40 = vmul.f32 %v1798_v63, %v761_v7  ;;  %v1811_v61 = vsel %vm744_vm7, 1.0, %v1417_v1  ;;  %v600_v19 = vmul.f32 %v595_v62, %v1613_v16 }
 0x227   : > { %619 = vrot.lane.b32.xlu1 %v602_v5, %s1414_s28  ;;  %617 = vrot.lane.b32.xlu0 %v601_v4, %s1414_s28 }
 0x228   : > { %v768_v24 = vadd.f32 %v764_v18, %v630_v55  ;;  %v767_v25 = vadd.f32 %v763_v40, %v629_v51 }
 0x22c   : > { %v772_v29 = vpop.permute.xlu1 %771  ;;  %v720_v31 = vpop.permute.xlu2 %719 }
 0x22d   : > { %v780_v32 = vsel %vm779_vm9, %v772_v29, %v776_v10  ;;  %v782_v34 = vsel %vm779_vm9, %v776_v10, %v772_v29 }
 0x22e   : > { %v784_v50 = vmul.f32 %v1811_v61, %v780_v32  ;;  %v785_v35 = vmul.f32 %v1813_v23, %v782_v34 }
 0x22f   : > { %615 = vrot.lane.b32.xlu1 %v600_v19, %s1414_s28  ;;  %756 = vrot.lane.b32.xlu0 %v1747_v21, %s1415_s27  ;;  %v716_v21 = vpop.permute.xlu0 %715  ;;  %s1327_s28 = scalar_lea.hbm %s1326_s30, 8 }
 0x230   : > { %v1825_v37 = vadd.f32 %v784_v50, %v767_v25  ;;  %v1827_v30 = vadd.f32 %v785_v35, %v768_v24  ;;  %p1328_p1 = scmp.ne.s32.totalorder %s1326_s30, %s1327_s28  ;;  %p1333_p12 = scmp.lt.s32.totalorder %s1331_s12, %s1327_s28 }
 0x232   : > { %v1845_v16 = vmul.f32 0.70710677, %v1825_v37  ;;  %p1329_p9 = pnand %p1328_p1, %p1519_p4  ;;  %p1334_p13 = por %p1333_p12, %p1332_p11 }
 0x234   : > { %v676_v59 = vpop.permute.xlu1 %675  ;;  %p1330_p10 = pneg %p1329_p9 }
 0x235   : > { %v680_v36 = vsel %vm475_vm2, %v674_v52, %v676_v59  ;;  %vm965_vm2 = vcmask 1043456  }
 0x236   : > { %v688_v17 = vadd.f32 %v680_v36, %v644_v43  ;;  %p1335_p0 = pnand %p1334_p13, %p1330_p10 }
 0x237   : > { %885 = vperm.xlu1 %1239, %v882_v39  }
 0x23c   : > { %v718_v3 = vpop.permute.xlu1 %717 }
 0x23d   : > { %v723_v45 = vsel %vm520_vm3, %v716_v21, %v718_v3  ;;  %v724_v33 = vsel %vm520_vm3, %v718_v3, %v720_v31 }
 0x23e   : > { %v731_v46 = vadd.f32 %v723_v45, %v687_v15  ;;  %v732_v47 = vadd.f32 %v724_v33, %v688_v17 }
 0x23f   : > { %1241 = vset.pattern.permute.xlu1 %v1406_v8  ;;  %v1848_v8 = vmul.f32 0.70710677, %v1827_v30 }
 0x240   : > { %913 = vperm.xlu1 %1241, %v882_v39   ;;  %773 = vrot.lane.b32.xlu2 %v731_v46, %s1416_s29 }
 0x241   : > { %777 = vrot.lane.b32.xlu0 %v732_v47, %s1416_s29 }
 0x248   : > { %1244 = vset.pattern.permute.xlu1 %v1408_v12  ;;  %893 = vperm.xlu2 %1240, %v882_v39   ;;  %v796_v12 = vmul.f32 %v1845_v16, %v1845_v16 }
 0x249   : > { %903 = vperm.xlu0 %1237, %v882_v39   ;;  %943 = vperm.xlu1 %1244, %v882_v39  }
 0x250   : > { %1242 = vset.pattern.permute.xlu2 %v1409_v13  ;;  %v836_v13 = vmul.f32 %v1848_v8, %v1848_v8 }
 0x251   : > { %1243 = vset.pattern.permute.xlu0 %v1407_v11  ;;  %923 = vperm.xlu2 %1242, %v882_v39   ;;  %v797_v11 = vmin.f32 %v796_v12, 16.0 }
 0x252   : > { %933 = vperm.xlu0 %1243, %v882_v39   ;;  %v837_v20 = vmin.f32 %v836_v13, 16.0 }
 0x253   : > { %v809_v49 = vmul.f32 3.8918573e-05, %v797_v11  ;;  %v798_v2 = vmul.f32 2.1237322e-06, %v797_v11 }
 0x254   : > { %v849_v22 = vmul.f32 3.8918573e-05, %v837_v20  ;;  %v838_v62 = vmul.f32 2.1237322e-06, %v837_v20 }
 0x255   : > { %v810_v57 = vadd.f32 0.001143296, %v809_v49  ;;  %v799_v4 = vadd.f32 0.00028619796, %v798_v2 }
 0x256   : > { %v850_v51 = vadd.f32 0.001143296, %v849_v22  ;;  %v839_v6 = vadd.f32 0.00028619796, %v838_v62 }
 0x257   : > { %v811_v52 = vmul.f32 %v810_v57, %v797_v11  ;;  %v800_v18 = vmul.f32 %v799_v4, %v797_v11 }
 0x258   : > { %v851_v54 = vmul.f32 %v850_v51, %v837_v20  ;;  %v840_v24 = vmul.f32 %v839_v6, %v837_v20  ;;  %v753_v51 = vpop.permute.xlu2 %752 }
 0x259   : > { %1245 = vset.pattern.permute.xlu2 %v1413_v28  ;;  %v812_v9 = vadd.f32 0.014752088, %v811_v52  ;;  %v801_v25 = vadd.f32 0.0036580483, %v800_v18 }
 0x25a   : > { %953 = vperm.xlu2 %1245, %v882_v39   ;;  %1246 = vset.pattern.permute.xlu0 %v1413_v28  ;;  %v852_v55 = vadd.f32 0.014752088, %v851_v54  ;;  %v841_v29 = vadd.f32 0.0036580483, %v840_v24 }
 0x25b   : > { %v813_v56 = vmul.f32 %v812_v9, %v797_v11  ;;  %v802_v19 = vmul.f32 %v801_v25, %v797_v11 }
 0x25c   : > { %v853_v58 = vmul.f32 %v852_v55, %v837_v20  ;;  %v842_v34 = vmul.f32 %v841_v29, %v837_v20 }
 0x25d   : > { %v814_v53 = vadd.f32 0.112945676, %v813_v56  ;;  %v803_v35 = vadd.f32 0.05243302, %v802_v19 }
 0x25e   : > { %v854_v28 = vadd.f32 0.112945676, %v853_v58  ;;  %v843_v59 = vadd.f32 0.05243302, %v842_v34  ;;  %v793_v34 = vmul.f32 0.5, %v1827_v30 }
 0x25f   : > { %v815_v10 = vmul.f32 %v814_v53, %v797_v11  ;;  %v804_v27 = vmul.f32 %v803_v35, %v797_v11 }
 0x260   : > { %v855_v48 = vmul.f32 %v854_v28, %v837_v20  ;;  %v844_v36 = vmul.f32 %v843_v59, %v837_v20 }
 0x261   : > { %v816_v14 = vadd.f32 0.4994258, %v815_v10  ;;  %v805_v21 = vadd.f32 0.18741608, %v804_v27 }
 0x262   : > { %v856_v1 = vadd.f32 0.4994258, %v855_v48  ;;  %v845_v31 = vadd.f32 0.18741608, %v844_v36 }
 0x263   : > { %v817_v0 = vmul.f32 %v816_v14, %v797_v11  ;;  %v806_v17 = vmul.f32 %v805_v21, %v797_v11 }
 0x264   : > { %v857_v5 = vmul.f32 %v856_v1, %v837_v20  ;;  %v846_v46 = vmul.f32 %v845_v31, %v837_v20 }
 0x265   : > { %v818_v7 = vadd.f32 1.0, %v817_v0  ;;  %v807_v52 = vadd.f32 1.1283791, %v806_v17 }
 0x266   : > { %v858_v40 = vadd.f32 1.0, %v857_v5  ;;  %v847_v9 = vadd.f32 1.1283791, %v846_v46 }
 0x267   : > { %1247 = vrcp.f32 %v818_v7  ;;  %vm824_vm12 = vweird.f32 %v818_v7  ;;  %v830_v13 = vand.u32 2147483648, %v818_v7  ;;  %v828_v22 = vand.u32 2147483647, %v818_v7 }
 0x268   : > { %1249 = vrcp.f32 %v858_v40  ;;  %v870_v49 = vand.u32 2147483648, %v858_v40  ;;  %vm864_vm14 = vweird.f32 %v858_v40  ;;  %v868_v57 = vand.u32 2147483647, %v858_v40 }
 0x269   : > { %v831_v55 = vor.u32 1.1754944e-38, %v830_v13  ;;  %vm829_vm0 = vcmp.eq.f32.partialorder %v828_v22, 8.507059e+37  ;;  %v808_v53 = vmul.f32 %v807_v52, %v1845_v16  ;;  %v848_v28 = vmul.f32 %v847_v9, %v1848_v8 }
 0x26a   : > { %v871_v56 = vor.u32 1.1754944e-38, %v870_v49  ;;  %vm869_vm1 = vcmp.eq.f32.partialorder %v868_v57, 8.507059e+37 }
 0x26d   : > { %v1248_v32 = vpop.eup %1247 }
 0x26e   : > { %v1250_v50 = vpop.eup %1249  ;;  %v820_v38 = vmul.f32 %v1248_v32, %v818_v7  ;;  %vm825_vm10 = vweird.f32 %v1248_v32 }
 0x26f   : > { %v860_v39 = vmul.f32 %v1250_v50, %v858_v40  ;;  %vm865_vm11 = vweird.f32 %v1250_v50  ;;  %vm826_vm13 = vmor %vm824_vm12, %vm825_vm10 }
 0x270   : > { %v821_v41 = vsub.f32 1.0, %v820_v38  ;;  %vm866_vm15 = vmor %vm864_vm14, %vm865_vm11 }
 0x271   : > { %v861_v43 = vsub.f32 1.0, %v860_v39 }
 0x272   : > { %v822_v15 = vmul.f32 %v1248_v32, %v821_v41 }
 0x273   : > { %v862_v3 = vmul.f32 %v1250_v50, %v861_v43 }
 0x274   : > { %v823_v33 = vadd.f32 %v1248_v32, %v822_v15 }
 0x275   : > { %v863_v47 = vadd.f32 %v1250_v50, %v862_v3 }
 0x276   : > { %v827_v54 = vsel %vm826_vm13, %v1248_v32, %v823_v33  ;;  %v792_v32 = vmul.f32 0.5, %v1825_v37 }
 0x277   : > { %v867_v11 = vsel %vm866_vm15, %v1250_v50, %v863_v47  ;;  %v832_v20 = vsel %vm829_vm0, %v831_v55, %v827_v54 }
 0x278   : > { %v872_v58 = vsel %vm869_vm1, %v871_v56, %v867_v11  ;;  %v833_v48 = vmul.f32 %v832_v20, %v808_v53 }
 0x279   : > { %v873_v14 = vmul.f32 %v872_v58, %v848_v28 }
 0x27a   : > { %v1115_v5 = vclamps-f32 %v833_v48, 1.0 }
 0x27b   : > { %v1116_v6 = vclamps-f32 %v873_v14, 1.0 }
 0x27c   : > { %v876_v25 = vadd.f32 1.0, %v1115_v5 }
 0x27d   : > { %v877_v29 = vadd.f32 1.0, %v1116_v6 }
 0x27e   : > { %v878_v59 = vmul.f32 %v876_v25, %v792_v32 }
 0x27f   : > { %v879_v39 = vmul.f32 %v877_v29, %v793_v34 }
 0x299   : > { %v620_v45 = vpop.permute.xlu1 %619  ;;  %v618_v12 = vpop.permute.xlu0 %617 }
 0x29a   : > { %v774_v1 = vpop.permute.xlu2 %773  ;;  %v624_v7 = vsel %vm520_vm3, %v618_v12, %v620_v45 }
 0x29b   : > { %v632_v24 = vadd.f32 %v624_v7, %v1752_v26 }
 0x2a1   : > { %v616_v10 = vpop.permute.xlu1 %615  ;;  %v757_v2 = vpop.permute.xlu0 %756 }
 0x2a2   : > { %v623_v62 = vsel %vm520_vm3, %v616_v10, %v618_v12  ;;  %v760_v0 = vsel %vm758_vm6, %v753_v51, %v757_v2  ;;  %v762_v4 = vsel %vm758_vm6, %v757_v2, %v753_v51  ;;  %v894_v50 = vpop.permute.xlu2 %893 }
 0x2a3   : > { %v631_v16 = vadd.f32 %v623_v62, %v1724_v44  ;;  %v765_v8 = vmul.f32 %v1798_v63, %v762_v4  ;;  %v766_v18 = vmul.f32 %v1796_v42, %v760_v0 }
 0x2a5   : > { %v769_v63 = vadd.f32 %v765_v8, %v631_v16  ;;  %v770_v38 = vadd.f32 %v766_v18, %v632_v24 }
 0x2a9   : > { %v886_v40 = vpop.permute.xlu1 %885 }
 0x2ab   : > { %v924_v45 = vpop.permute.xlu2 %923 }
 0x2b2   : > { %v914_v43 = vpop.permute.xlu1 %913 }
 0x2b3   : > { %v778_v19 = vpop.permute.xlu0 %777 }
 0x2b4   : > { %v781_v35 = vsel %vm779_vm9, %v774_v1, %v778_v19  ;;  %v783_v44 = vsel %vm779_vm9, %v778_v19, %v774_v1  ;;  %v954_v7 = vpop.permute.xlu2 %953 }
 0x2b5   : > { %v786_v42 = vmul.f32 %v1811_v61, %v781_v35  ;;  %v787_v26 = vmul.f32 %v1813_v23, %v783_v44 }
 0x2b7   : > { %v790_v27 = vadd.f32 %v786_v42, %v769_v63  ;;  %v791_v41 = vadd.f32 %v787_v26, %v770_v38 }
 0x2b9   : > { %v880_v37 = vmul.f32 %v878_v59, %v790_v27  ;;  %v881_v36 = vmul.f32 %v879_v39, %v791_v41 }
 0x2bb   : > { %v904_v30 = vpop.permute.xlu0 %903  ;;  %v888_v21 = vperm.slane %v880_v37, 0  ;;  %v889_v15 = vperm.slane %v881_v36, 0  ;;  %v896_v31 = vperm.slane %v880_v37, 1  ;;  %v897_v3 = vperm.slane %v881_v36, 1  ;;  %v944_v0 = vpop.permute.xlu1 %943 }
 0x2bc   : > { %v916_v60 = vperm.slane %v880_v37, 3  ;;  %v917_v17 = vperm.slane %v881_v36, 3  ;;  %v906_v23 = vperm.slane %v880_v37, 2  ;;  %v907_v12 = vperm.slane %v881_v36, 2 }
 0x2bd   : > { %v890_v33 = vmul.f32 %v888_v21, %v886_v40  ;;  %v891_v46 = vmul.f32 %v889_v15, %v886_v40  ;;  %v898_v61 = vmul.f32 %v896_v31, %v894_v50  ;;  %v899_v47 = vmul.f32 %v897_v3, %v894_v50 }
 0x2be   : > { %v926_v13 = vperm.slane %v880_v37, 4  ;;  %v927_v49 = vperm.slane %v881_v36, 4  ;;  %v908_v51 = vmul.f32 %v906_v23, %v904_v30  ;;  %v909_v52 = vmul.f32 %v907_v12, %v904_v30 }
 0x2bf   : > { %v900_v22 = vadd.f32 %v898_v61, %v890_v33  ;;  %v901_v57 = vadd.f32 %v899_v47, %v891_v46  ;;  %v918_v54 = vmul.f32 %v916_v60, %v914_v43  ;;  %v919_v9 = vmul.f32 %v917_v17, %v914_v43 }
 0x2c0   : > { %v936_v56 = vperm.slane %v880_v37, 5  ;;  %v937_v20 = vperm.slane %v881_v36, 5  ;;  %v928_v58 = vmul.f32 %v926_v13, %v924_v45  ;;  %v929_v53 = vmul.f32 %v927_v49, %v924_v45 }
 0x2c1   : > { %v910_v11 = vadd.f32 %v908_v51, %v900_v22  ;;  %v911_v55 = vadd.f32 %v909_v52, %v901_v57  ;;  %v946_v28 = vperm.slane %v880_v37, 6  ;;  %v947_v10 = vperm.slane %v881_v36, 6 }
 0x2c2   : > { %v957_v4 = vperm.slane %v881_v36, 7  ;;  %v956_v16 = vperm.slane %v880_v37, 7 }
 0x2c3   : > { %v920_v14 = vadd.f32 %v918_v54, %v910_v11  ;;  %v921_v2 = vadd.f32 %v919_v9, %v911_v55  ;;  %v948_v8 = vmul.f32 %v946_v28, %v944_v0  ;;  %v949_v18 = vmul.f32 %v947_v10, %v944_v0 }
 0x2c4   : > { %v934_v48 = vpop.permute.xlu0 %933  ;;  %v959_v25 = vmul.f32 %v957_v4, %v954_v7  ;;  %v958_v32 = vmul.f32 %v956_v16, %v954_v7 }
 0x2c5   : > { %v938_v1 = vmul.f32 %v936_v56, %v934_v48  ;;  %v939_v62 = vmul.f32 %v937_v20, %v934_v48  ;;  %v930_v5 = vadd.f32 %v928_v58, %v920_v14  ;;  %v931_v6 = vadd.f32 %v929_v53, %v921_v2 }
 0x2c7   : > { %v940_v40 = vadd.f32 %v938_v1, %v930_v5  ;;  %v941_v24 = vadd.f32 %v939_v62, %v931_v6 }
 0x2c9   : > { %v950_v29 = vadd.f32 %v948_v8, %v940_v40  ;;  %v951_v19 = vadd.f32 %v949_v18, %v941_v24 }
 0x2cb   : > { %v961_v34 = vadd.f32 %v959_v25, %v951_v19  ;;  %v960_v50 = vadd.f32 %v958_v32, %v950_v29 }
 0x2cd   : > { %v964_v35 = vrot.slane %v961_v34, 4 }
 0x2cf   : > { %v966_v44 = vsel %vm965_vm2, %v960_v50, %v964_v35 }
 0x2d0   : > { %968 = vst [vmem:[%s301_s8] sm:$0xff] %v966_v44 }
 0x2d1   : > { %1338 = shalt.err (!%p1335_p0)
}
 0x2d2   : > { %1130 = dma.vmem_to_hbm [thread:$0]  (%p1519_p4), %s986_s9, 128, %s988_s21, %s970_s11  }
 0x2d3 PF: > { %s999_s14 = sand.u32 1, %s1377_s18   ;;  %p1141_p2 = pnand %p1102_p6, %p1527_p7 }
 0x2d4   : > { %s1000_s6 = scalar_lea.sflag [#allocation4], %s999_s14 }
 0x2d5   : > { %p1142_p5 = pneg %p1141_p2 }
 0x2d7   : > { %1372 = dma.done.wait (%p1142_p5), %s1000_s6, 128  }
 0x2d8   : > { %1374 = vsyncadd (%p1142_p5), %s1000_s6, 4294967168  ;;  %s22_s23 = sadd.s32 1, %s1397_s23   ;;  %s1927_s18 = smov %s1381_s19 }
 0x2d9   : > { %p19_p8 = scmp.ge.s32.totalorder %s22_s23, 4   ;;  %s1928_s19 = smov %s1385_s20 }
 0x2da   : > { %s1929_s20 = smov %s1525_s16  ;;  %s1930_s21 = smov %s1393_s22 }
 0x2db   : > { %s1931_s22 = smov %s1933_s10  ;;  %21 = sbr.rel (!%p19_p8) target bundleno = 7 (0x7), region = 92 }
 0x2e0   :  { %1006 = vsyncpa [#allocation3], 1 }
 0x2e1   :  { %1008 = vsyncpa [#allocation3 + $0x1], 1 }
 0x2e2   :  { %1009 = vsyncpa [#allocation6], 1 }
 0x2e3   :  { %1010 = vsyncpa [#allocation4], 1 }
 0x2e4   :  { %1012 = vsyncpa [#allocation4 + $0x1], 1 }

</bundles_post_ra>
